<compile_context>
chip_gen: v5e
topology: v5e:2x2
jax: 0.10.0
libtpu: 0.0.40
codegen_flags: <defaults>
</compile_context>

<pallas_src>
import functools

import numpy as np
import jax
import jax.numpy as jnp
from jax import lax
from jax.experimental import pallas as pl
from jax.experimental.pallas import tpu as pltpu


def _grid_loss_kernel(theta_ref, theta_gt_ref, out_ref, *, gram, batch, n_points):
    # theta_ref, theta_gt_ref : SMEM [6*B] f32 (flattened affine params)
    # out_ref                 : SMEM [1, 1]  f32 scalar loss
    # gram = (Sxx, Syy, N, 2*Sxy, 2*Sx, 2*Sy) — compile-time constants of the grid.
    g_xx = jnp.float32(gram[0])
    g_yy = jnp.float32(gram[1])
    g_11 = jnp.float32(gram[2])
    g_xy2 = jnp.float32(gram[3])
    g_x2 = jnp.float32(gram[4])
    g_y2 = jnp.float32(gram[5])

    def quad(v0, v1, v2):
        # v^T G v for symmetric 3x3 G, cross terms pre-doubled.
        return (g_xx * v0 * v0 + g_yy * v1 * v1 + g_11 * v2 * v2
                + g_xy2 * v0 * v1 + g_x2 * v0 * v2 + g_y2 * v1 * v2)

    def body(b, acc):
        base = 6 * b
        d0 = theta_ref[base + 0] - theta_gt_ref[base + 0]
        d1 = theta_ref[base + 1] - theta_gt_ref[base + 1]
        d2 = theta_ref[base + 2] - theta_gt_ref[base + 2]
        d3 = theta_ref[base + 3] - theta_gt_ref[base + 3]
        d4 = theta_ref[base + 4] - theta_gt_ref[base + 4]
        d5 = theta_ref[base + 5] - theta_gt_ref[base + 5]
        return acc + quad(d0, d1, d2) + quad(d3, d4, d5)

    # Small B -> fully unrolled; large B -> bounded unroll keeps live ranges small.
    total = lax.fori_loop(0, batch, body, jnp.float32(0.0),
                          unroll=min(batch, 8))
    out_ref[0, 0] = total * jnp.float32(1.0 / (batch * n_points))


def make_grid(grid_size=20):
    """Regular grid P of shape [2, N] in [-1, 1]^2 (numpy, float64 for exact sums)."""
    axis_coords = np.linspace(-1, 1, grid_size)
    X, Y = np.meshgrid(axis_coords, axis_coords)
    X = np.reshape(X, (1, grid_size * grid_size))
    Y = np.reshape(Y, (1, grid_size * grid_size))
    return np.concatenate((X, Y), axis=0)  # [2, N], float64


def make_transformed_grid_loss(grid_size=20):
    """Builds the fixed grid (as in the module __init__) and returns a jitted
    loss_fn(theta, theta_gt) -> scalar f32 for the 'affine' geometric model."""
    P = make_grid(grid_size)
    Px, Py = P[0], P[1]
    n_points = P.shape[1]
    # Gram matrix of [Px, Py, 1] rows, reduced in float64 on the host once.
    gram = (
        float(np.sum(Px * Px)),        # Sxx
        float(np.sum(Py * Py)),        # Syy
        float(n_points),               # S11
        float(2.0 * np.sum(Px * Py)),  # 2*Sxy
        float(2.0 * np.sum(Px)),       # 2*Sx
        float(2.0 * np.sum(Py)),       # 2*Sy
    )

    @jax.jit
    def loss_fn(theta, theta_gt):
        batch = theta.shape[0]
        kernel = functools.partial(
            _grid_loss_kernel, gram=gram, batch=batch, n_points=n_points)
        out = pl.pallas_call(
            kernel,
            out_shape=jax.ShapeDtypeStruct((1, 1), jnp.float32),
            in_specs=[
                pl.BlockSpec(memory_space=pltpu.MemorySpace.SMEM),
                pl.BlockSpec(memory_space=pltpu.MemorySpace.SMEM),
            ],
            out_specs=pl.BlockSpec(memory_space=pltpu.MemorySpace.SMEM),
        )(theta.astype(jnp.float32).reshape(-1),
          theta_gt.astype(jnp.float32).reshape(-1))
        return out[0, 0]

    return loss_fn


def _reference_loss(theta, theta_gt, P):
    B = theta.shape[0]
    A = theta.reshape(B, 2, 3)
    Ag = theta_gt.reshape(B, 2, 3)
    wp = jnp.einsum('bij,jn->bin', A[:, :, :2], P) + A[:, :, 2:3]
    wpg = jnp.einsum('bij,jn->bin', Ag[:, :, :2], P) + Ag[:, :, 2:3]
    return jnp.mean(jnp.sum((wp - wpg) ** 2, axis=1))


# TODO(synk): 'tps' and 'hom' geometric_model branches (PointTnf.tpsPointTnf /
# homPointTnf) are not implemented; only the 'affine' path is translated.

if __name__ == "__main__":
    grid_size = 20          # module default -> N = 400
    batch = 2

    key = jax.random.PRNGKey(0)
    k1, k2 = jax.random.split(key)
    # "identity-ish" affine params plus noise, deterministic
    ident = jnp.array([1.0, 0.0, 0.0, 0.0, 1.0, 0.0], dtype=jnp.float32)
    theta = ident[None, :] + 0.1 * jax.random.normal(k1, (batch, 6), dtype=jnp.float32)
    theta_gt = ident[None, :] + 0.1 * jax.random.normal(k2, (batch, 6), dtype=jnp.float32)

    loss_fn = make_transformed_grid_loss(grid_size)
    loss = jax.block_until_ready(loss_fn(theta, theta_gt))

    P = jnp.asarray(make_grid(grid_size), dtype=jnp.float32)
    ref = _reference_loss(theta, theta_gt, P)
    assert np.allclose(np.asarray(loss), np.asarray(ref), rtol=1e-5, atol=1e-6), (
        f"pallas={loss} ref={ref}")

    print("KERNEL_OK")
</pallas_src>

<mosaic_0001>
module attributes {stable_mosaic.version = 11 : i64} {
  func.func @_grid_loss_kernel(%arg0: memref<12xf32, #tpu.memory_space<smem>>, %arg1: memref<12xf32, #tpu.memory_space<smem>>, %arg2: memref<1x1xf32, #tpu.memory_space<smem>>) attributes {dimension_semantics = [], scalar_prefetch = 0 : i64, scratch_operands = 0 : i64, tpu.core_type = #tpu.core_type<tc>} {
    %cst = arith.constant 147.368423 : f32
    %cst_0 = arith.constant 147.368423 : f32
    %cst_1 = arith.constant 4.000000e+02 : f32
    %cst_2 = arith.constant -4.4408921E-16 : f32
    %cst_3 = arith.constant -3.55271368E-14 : f32
    %cst_4 = arith.constant -5.68434189E-14 : f32
    %cst_5 = arith.constant 0.000000e+00 : f32
    %c0_i32 = arith.constant 0 : i32
    %c6_i32 = arith.constant 6 : i32
    %0 = arith.muli %c6_i32, %c0_i32 : i32
    %c0_i32_6 = arith.constant 0 : i32
    %1 = arith.addi %0, %c0_i32_6 : i32
    %2 = arith.index_cast %1 : i32 to index
    %3 = memref.load %arg0[%2] : memref<12xf32, #tpu.memory_space<smem>>
    %c0_i32_7 = arith.constant 0 : i32
    %4 = arith.addi %0, %c0_i32_7 : i32
    %5 = arith.index_cast %4 : i32 to index
    %6 = memref.load %arg1[%5] : memref<12xf32, #tpu.memory_space<smem>>
    %7 = arith.subf %3, %6 : f32
    %c1_i32 = arith.constant 1 : i32
    %8 = arith.addi %0, %c1_i32 : i32
    %9 = arith.index_cast %8 : i32 to index
    %10 = memref.load %arg0[%9] : memref<12xf32, #tpu.memory_space<smem>>
    %c1_i32_8 = arith.constant 1 : i32
    %11 = arith.addi %0, %c1_i32_8 : i32
    %12 = arith.index_cast %11 : i32 to index
    %13 = memref.load %arg1[%12] : memref<12xf32, #tpu.memory_space<smem>>
    %14 = arith.subf %10, %13 : f32
    %c2_i32 = arith.constant 2 : i32
    %15 = arith.addi %0, %c2_i32 : i32
    %16 = arith.index_cast %15 : i32 to index
    %17 = memref.load %arg0[%16] : memref<12xf32, #tpu.memory_space<smem>>
    %c2_i32_9 = arith.constant 2 : i32
    %18 = arith.addi %0, %c2_i32_9 : i32
    %19 = arith.index_cast %18 : i32 to index
    %20 = memref.load %arg1[%19] : memref<12xf32, #tpu.memory_space<smem>>
    %21 = arith.subf %17, %20 : f32
    %c3_i32 = arith.constant 3 : i32
    %22 = arith.addi %0, %c3_i32 : i32
    %23 = arith.index_cast %22 : i32 to index
    %24 = memref.load %arg0[%23] : memref<12xf32, #tpu.memory_space<smem>>
    %c3_i32_10 = arith.constant 3 : i32
    %25 = arith.addi %0, %c3_i32_10 : i32
    %26 = arith.index_cast %25 : i32 to index
    %27 = memref.load %arg1[%26] : memref<12xf32, #tpu.memory_space<smem>>
    %28 = arith.subf %24, %27 : f32
    %c4_i32 = arith.constant 4 : i32
    %29 = arith.addi %0, %c4_i32 : i32
    %30 = arith.index_cast %29 : i32 to index
    %31 = memref.load %arg0[%30] : memref<12xf32, #tpu.memory_space<smem>>
    %c4_i32_11 = arith.constant 4 : i32
    %32 = arith.addi %0, %c4_i32_11 : i32
    %33 = arith.index_cast %32 : i32 to index
    %34 = memref.load %arg1[%33] : memref<12xf32, #tpu.memory_space<smem>>
    %35 = arith.subf %31, %34 : f32
    %c5_i32 = arith.constant 5 : i32
    %36 = arith.addi %0, %c5_i32 : i32
    %37 = arith.index_cast %36 : i32 to index
    %38 = memref.load %arg0[%37] : memref<12xf32, #tpu.memory_space<smem>>
    %c5_i32_12 = arith.constant 5 : i32
    %39 = arith.addi %0, %c5_i32_12 : i32
    %40 = arith.index_cast %39 : i32 to index
    %41 = memref.load %arg1[%40] : memref<12xf32, #tpu.memory_space<smem>>
    %42 = arith.subf %38, %41 : f32
    %43 = arith.mulf %cst, %7 : f32
    %44 = arith.mulf %43, %7 : f32
    %45 = arith.mulf %cst_0, %14 : f32
    %46 = arith.mulf %45, %14 : f32
    %47 = arith.addf %44, %46 : f32
    %48 = arith.mulf %cst_1, %21 : f32
    %49 = arith.mulf %48, %21 : f32
    %50 = arith.addf %47, %49 : f32
    %51 = arith.mulf %cst_2, %7 : f32
    %52 = arith.mulf %51, %14 : f32
    %53 = arith.addf %50, %52 : f32
    %54 = arith.mulf %cst_3, %7 : f32
    %55 = arith.mulf %54, %21 : f32
    %56 = arith.addf %53, %55 : f32
    %57 = arith.mulf %cst_4, %14 : f32
    %58 = arith.mulf %57, %21 : f32
    %59 = arith.addf %56, %58 : f32
    %60 = arith.addf %cst_5, %59 : f32
    %61 = arith.mulf %cst, %28 : f32
    %62 = arith.mulf %61, %28 : f32
    %63 = arith.mulf %cst_0, %35 : f32
    %64 = arith.mulf %63, %35 : f32
    %65 = arith.addf %62, %64 : f32
    %66 = arith.mulf %cst_1, %42 : f32
    %67 = arith.mulf %66, %42 : f32
    %68 = arith.addf %65, %67 : f32
    %69 = arith.mulf %cst_2, %28 : f32
    %70 = arith.mulf %69, %35 : f32
    %71 = arith.addf %68, %70 : f32
    %72 = arith.mulf %cst_3, %28 : f32
    %73 = arith.mulf %72, %42 : f32
    %74 = arith.addf %71, %73 : f32
    %75 = arith.mulf %cst_4, %35 : f32
    %76 = arith.mulf %75, %42 : f32
    %77 = arith.addf %74, %76 : f32
    %78 = arith.addf %60, %77 : f32
    %c1_i32_13 = arith.constant 1 : i32
    %c6_i32_14 = arith.constant 6 : i32
    %79 = arith.muli %c6_i32_14, %c1_i32_13 : i32
    %c0_i32_15 = arith.constant 0 : i32
    %80 = arith.addi %79, %c0_i32_15 : i32
    %81 = arith.index_cast %80 : i32 to index
    %82 = memref.load %arg0[%81] : memref<12xf32, #tpu.memory_space<smem>>
    %c0_i32_16 = arith.constant 0 : i32
    %83 = arith.addi %79, %c0_i32_16 : i32
    %84 = arith.index_cast %83 : i32 to index
    %85 = memref.load %arg1[%84] : memref<12xf32, #tpu.memory_space<smem>>
    %86 = arith.subf %82, %85 : f32
    %c1_i32_17 = arith.constant 1 : i32
    %87 = arith.addi %79, %c1_i32_17 : i32
    %88 = arith.index_cast %87 : i32 to index
    %89 = memref.load %arg0[%88] : memref<12xf32, #tpu.memory_space<smem>>
    %c1_i32_18 = arith.constant 1 : i32
    %90 = arith.addi %79, %c1_i32_18 : i32
    %91 = arith.index_cast %90 : i32 to index
    %92 = memref.load %arg1[%91] : memref<12xf32, #tpu.memory_space<smem>>
    %93 = arith.subf %89, %92 : f32
    %c2_i32_19 = arith.constant 2 : i32
    %94 = arith.addi %79, %c2_i32_19 : i32
    %95 = arith.index_cast %94 : i32 to index
    %96 = memref.load %arg0[%95] : memref<12xf32, #tpu.memory_space<smem>>
    %c2_i32_20 = arith.constant 2 : i32
    %97 = arith.addi %79, %c2_i32_20 : i32
    %98 = arith.index_cast %97 : i32 to index
    %99 = memref.load %arg1[%98] : memref<12xf32, #tpu.memory_space<smem>>
    %100 = arith.subf %96, %99 : f32
    %c3_i32_21 = arith.constant 3 : i32
    %101 = arith.addi %79, %c3_i32_21 : i32
    %102 = arith.index_cast %101 : i32 to index
    %103 = memref.load %arg0[%102] : memref<12xf32, #tpu.memory_space<smem>>
    %c3_i32_22 = arith.constant 3 : i32
    %104 = arith.addi %79, %c3_i32_22 : i32
    %105 = arith.index_cast %104 : i32 to index
    %106 = memref.load %arg1[%105] : memref<12xf32, #tpu.memory_space<smem>>
    %107 = arith.subf %103, %106 : f32
    %c4_i32_23 = arith.constant 4 : i32
    %108 = arith.addi %79, %c4_i32_23 : i32
    %109 = arith.index_cast %108 : i32 to index
    %110 = memref.load %arg0[%109] : memref<12xf32, #tpu.memory_space<smem>>
    %c4_i32_24 = arith.constant 4 : i32
    %111 = arith.addi %79, %c4_i32_24 : i32
    %112 = arith.index_cast %111 : i32 to index
    %113 = memref.load %arg1[%112] : memref<12xf32, #tpu.memory_space<smem>>
    %114 = arith.subf %110, %113 : f32
    %c5_i32_25 = arith.constant 5 : i32
    %115 = arith.addi %79, %c5_i32_25 : i32
    %116 = arith.index_cast %115 : i32 to index
    %117 = memref.load %arg0[%116] : memref<12xf32, #tpu.memory_space<smem>>
    %c5_i32_26 = arith.constant 5 : i32
    %118 = arith.addi %79, %c5_i32_26 : i32
    %119 = arith.index_cast %118 : i32 to index
    %120 = memref.load %arg1[%119] : memref<12xf32, #tpu.memory_space<smem>>
    %121 = arith.subf %117, %120 : f32
    %122 = arith.mulf %cst, %86 : f32
    %123 = arith.mulf %122, %86 : f32
    %124 = arith.mulf %cst_0, %93 : f32
    %125 = arith.mulf %124, %93 : f32
    %126 = arith.addf %123, %125 : f32
    %127 = arith.mulf %cst_1, %100 : f32
    %128 = arith.mulf %127, %100 : f32
    %129 = arith.addf %126, %128 : f32
    %130 = arith.mulf %cst_2, %86 : f32
    %131 = arith.mulf %130, %93 : f32
    %132 = arith.addf %129, %131 : f32
    %133 = arith.mulf %cst_3, %86 : f32
    %134 = arith.mulf %133, %100 : f32
    %135 = arith.addf %132, %134 : f32
    %136 = arith.mulf %cst_4, %93 : f32
    %137 = arith.mulf %136, %100 : f32
    %138 = arith.addf %135, %137 : f32
    %139 = arith.addf %78, %138 : f32
    %140 = arith.mulf %cst, %107 : f32
    %141 = arith.mulf %140, %107 : f32
    %142 = arith.mulf %cst_0, %114 : f32
    %143 = arith.mulf %142, %114 : f32
    %144 = arith.addf %141, %143 : f32
    %145 = arith.mulf %cst_1, %121 : f32
    %146 = arith.mulf %145, %121 : f32
    %147 = arith.addf %144, %146 : f32
    %148 = arith.mulf %cst_2, %107 : f32
    %149 = arith.mulf %148, %114 : f32
    %150 = arith.addf %147, %149 : f32
    %151 = arith.mulf %cst_3, %107 : f32
    %152 = arith.mulf %151, %121 : f32
    %153 = arith.addf %150, %152 : f32
    %154 = arith.mulf %cst_4, %114 : f32
    %155 = arith.mulf %154, %121 : f32
    %156 = arith.addf %153, %155 : f32
    %157 = arith.addf %139, %156 : f32
    %c2_i32_27 = arith.constant 2 : i32
    %cst_28 = arith.constant 1.250000e-03 : f32
    %158 = arith.mulf %157, %cst_28 : f32
    %c0 = arith.constant 0 : index
    %c0_29 = arith.constant 0 : index
    %159 = memref.load %arg2[%c0, %c0_29] : memref<1x1xf32, #tpu.memory_space<smem>>
    memref.store %158, %arg2[%c0, %c0_29] : memref<1x1xf32, #tpu.memory_space<smem>>
    return
  }
}

</mosaic_0001>

<bundles_post_ra>
// kernel: loss_fn.1
= control target key start
LH: loop header
LB: loop body
LE: loop exit
PB: predicated region body
PF: predicated region fallthrough
CT: control target
= control target key end

     0   :  { %s310_s0 = inlined_call_operand.vmem [shape: f32[12], index: 0, kind: input, shape index: {}]   ;;  %s311_s1 = inlined_call_operand.vmem [shape: f32[12], index: 1, kind: input, shape index: {}]   ;;  %s312_s2 = inlined_call_operand.hbm [shape: f32[1,1], index: 2, kind: output, shape index: {}]  }
   0x1   :  { %314 = sst [smem:[#allocation12_spill]] %s312_s2 }
   0x2   :  { %7 = vsyncpa [#allocation4], 0 }
   0x3   :  { %8 = vsyncpa [#allocation6], 0 }
   0x4   :  { %9 = vsyncpa [#allocation3], 0  ;;  %s15_s11 = sshll.u32 %s310_s0, 4  ;;  %s24_s14 = sshll.u32 %s311_s1, 4  ;;  %s16_s11 = int_to_ptr.vmem [resolvable:$true] %s15_s11  ;;  %s25_s14 = int_to_ptr.vmem [resolvable:$true] %s24_s14 }
   0x5   :  { %s232_s15 = smov [#allocation2]   ;;  %s233_s16 = smov [#allocation5]  }
   0x6   :  { %18 = dma.vmem_to_smem %s16_s11, 16, %s232_s15, [#allocation4]  }
   0x7   :  { %27 = dma.vmem_to_smem %s25_s14, 16, %s233_s16, [#allocation6]  }
   0x8   :  { %226 = dma.done.wait [#allocation4], 16  }
   0x9   :  { %227 = vsyncadd [#allocation4], 4294967280 }
   0xa   :  { %228 = dma.done.wait [#allocation6], 16  }
   0xb   :  { %229 = vsyncadd [#allocation6], 4294967280 }
   0xc   :  { %36 = sfence }
   0xd   :  { %s37_s17 = sld [smem:[#allocation2]] }
   0xe   :  { %s38_s18 = sld [smem:[#allocation5]] }
   0xf   :  { %s165_s19 = sld [smem:[#allocation2 + $0x1]] }
  0x10   :  { %s166_s20 = sld [smem:[#allocation5 + $0x1]] }
  0x11   :  { %s167_s0 = sld [smem:[#allocation2 + $0x2]] }
  0x12   :  { %s168_s21 = sld [smem:[#allocation5 + $0x2]] }
  0x13   :  { %s169_s22 = sld [smem:[#allocation2 + $0x3]] }
  0x14   :  { %s39_s23 = ssub.f32 %s37_s17, %s38_s18 }
  0x15   :  { %s170_s24 = sld [smem:[#allocation5 + $0x3]] }
  0x16   :  { %s256_s1 = ssub.f32 %s165_s19, %s166_s20  ;;  %s55_s25 = smul.f32 147.36842, %s39_s23 }
  0x17   :  { %s171_s26 = sld [smem:[#allocation2 + $0x4]]  ;;  %s63_s27 = smul.f32 -4.440892e-16, %s39_s23 }
  0x18   :  { %s258_s28 = ssub.f32 %s167_s0, %s168_s21  ;;  %s56_s29 = smul.f32 %s55_s25, %s39_s23 }
  0x19   :  { %s172_s30 = sld [smem:[#allocation5 + $0x4]]  ;;  %s57_s3 = smul.f32 147.36842, %s256_s1 }
  0x1a   :  { %s173_s4 = sld [smem:[#allocation2 + $0x5]]  ;;  %s60_s5 = smul.f32 400.0, %s258_s28 }
  0x1b   :  { %s58_s6 = smul.f32 %s57_s3, %s256_s1  ;;  %s174_s7 = sld [smem:[#allocation5 + $0x5]] }
  0x1c   :  { %s61_s8 = smul.f32 %s60_s5, %s258_s28  ;;  %s264_s10 = ssub.f32 %s169_s22, %s170_s24 }
  0x1d   :  { %s59_s9 = sadd.f32 %s58_s6, %s56_s29  ;;  %s66_s11 = smul.f32 -3.5527137e-14, %s39_s23 }
  0x1e   :  { %s64_s14 = smul.f32 %s63_s27, %s256_s1  ;;  %s175_s16 = sld [smem:[#allocation2 + $0x6]] }
  0x1f   :  { %s266_s12 = ssub.f32 %s171_s26, %s172_s30  ;;  %s67_s15 = smul.f32 %s66_s11, %s258_s28 }
  0x20   :  { %s62_s13 = sadd.f32 %s61_s8, %s59_s9  ;;  %s73_s18 = smul.f32 147.36842, %s264_s10 }
  0x21   :  { %s54_s17 = ssub.f32 %s173_s4, %s174_s7  ;;  %s75_s19 = smul.f32 147.36842, %s266_s12 }
  0x22   :  { %s176_s20 = sld [smem:[#allocation5 + $0x6]]  ;;  %s74_s21 = smul.f32 %s73_s18, %s264_s10 }
  0x23   :  { %s65_s0 = sadd.f32 %s64_s14, %s62_s13  ;;  %s76_s22 = smul.f32 %s75_s19, %s266_s12 }
  0x24   :  { %s177_s23 = sld [smem:[#allocation2 + $0x7]]  ;;  %s78_s24 = smul.f32 400.0, %s54_s17 }
  0x25   :  { %s178_s25 = sld [smem:[#allocation5 + $0x7]]  ;;  %s69_s26 = smul.f32 -5.684342e-14, %s256_s1 }
  0x26   :  { %s81_s29 = smul.f32 -4.440892e-16, %s264_s10  ;;  %s276_s30 = sadd.f32 %s67_s15, %s65_s0 }
  0x27   :  { %s79_s27 = smul.f32 %s78_s24, %s54_s17  ;;  %s77_s3 = sadd.f32 %s76_s22, %s74_s21 }
  0x28   :  { %315 = sst [smem:[#allocation11_spill]] %s276_s30  ;;  %s84_s4 = smul.f32 -3.5527137e-14, %s264_s10 }
  0x29   :  { %s280_s5 = smul.f32 %s69_s26, %s258_s28  ;;  %s282_s6 = ssub.f32 %s175_s16, %s176_s20 }
  0x2a   :  { %s285_s7 = smul.f32 %s81_s29, %s266_s12  ;;  %s179_s8 = sld [smem:[#allocation2 + $0x8]] }
  0x2b   :  { %s87_s1 = smul.f32 -5.684342e-14, %s266_s12  ;;  %s288_s9 = ssub.f32 %s177_s23, %s178_s25 }
  0x2c   :  { %s80_s11 = sadd.f32 %s79_s27, %s77_s3  ;;  %s85_s10 = smul.f32 %s84_s4, %s54_s17 }
  0x2d   :  { %s180_s28 = sld [smem:[#allocation5 + $0x8]]  ;;  %s109_s13 = smul.f32 147.36842, %s282_s6 }
  0x2e   :  { %s111_s15 = smul.f32 147.36842, %s288_s9  ;;  %s181_s18 = sld [smem:[#allocation2 + $0x9]] }
  0x2f   :  { %s294_s16 = smul.f32 %s87_s1, %s54_s17  ;;  %s83_s19 = sadd.f32 %s285_s7, %s80_s11 }
  0x30   :  { %s117_s20 = smul.f32 -4.440892e-16, %s282_s6  ;;  %s182_s0 = sld [smem:[#allocation5 + $0x9]] }
  0x31   :  { %s110_s12 = smul.f32 %s109_s13, %s282_s6  ;;  %s183_s21 = sld [smem:[#allocation2 + $0xa]] }
  0x32   :  { %s112_s22 = smul.f32 %s111_s15, %s288_s9  ;;  %s184_s25 = sld [smem:[#allocation5 + $0xa]] }
  0x33   :  { %s99_s23 = ssub.f32 %s179_s8, %s180_s28  ;;  %s120_s24 = smul.f32 -3.5527137e-14, %s282_s6 }
  0x34   :  { %s118_s26 = smul.f32 %s117_s20, %s288_s9  ;;  %s185_s29 = sld [smem:[#allocation2 + $0xb]] }
  0x35   :  { %s114_s27 = smul.f32 400.0, %s99_s23  ;;  %s186_s3 = sld [smem:[#allocation5 + $0xb]] }
  0x36   :  { %s123_s4 = smul.f32 -5.684342e-14, %s288_s9  ;;  %s102_s14 = ssub.f32 %s181_s18, %s182_s0 }
  0x37   :  { %s115_s2 = smul.f32 %s114_s27, %s99_s23  ;;  %s113_s17 = sadd.f32 %s112_s22, %s110_s12 }
  0x38   :  { %s121_s1 = smul.f32 %s120_s24, %s99_s23  ;;  %s86_s30 = sadd.f32 %s85_s10, %s83_s19 }
  0x39   :  { %s127_s7 = smul.f32 147.36842, %s102_s14  ;;  %s316_s11 = sld [smem:[#allocation11_spill]] }
  0x3a   :  { %s105_s13 = ssub.f32 %s183_s21, %s184_s25  ;;  %s124_s15 = smul.f32 %s123_s4, %s99_s23 }
  0x3b   :  { %s116_s8 = sadd.f32 %s115_s2, %s113_s17  ;;  %s128_s28 = smul.f32 %s127_s7, %s102_s14 }
  0x3c   :  { %s108_s6 = ssub.f32 %s185_s29, %s186_s3  ;;  %s129_s20 = smul.f32 147.36842, %s105_s13 }
  0x3d   :  { %s119_s9 = sadd.f32 %s118_s26, %s116_s8  ;;  %s135_s0 = smul.f32 -4.440892e-16, %s102_s14 }
  0x3e   :  { %s89_s18 = sadd.f32 %s294_s16, %s86_s30  ;;  %s130_s27 = smul.f32 %s129_s20, %s105_s13 }
  0x3f   :  { %s122_s12 = sadd.f32 %s121_s1, %s119_s9  ;;  %s132_s22 = smul.f32 400.0, %s108_s6 }
  0x40   :  { %s131_s24 = sadd.f32 %s130_s27, %s128_s28  ;;  %s138_s10 = smul.f32 -3.5527137e-14, %s102_s14 }
  0x41   :  { %s133_s19 = smul.f32 %s132_s22, %s108_s6  ;;  %s317_s21 = sadd.f32 %s280_s5, %s316_s11 }
  0x42   :  { %s136_s4 = smul.f32 %s135_s0, %s105_s13  ;;  %s125_s23 = sadd.f32 %s124_s15, %s122_s12 }
  0x43   :  { %s90_s25 = sadd.f32 %s89_s18, %s317_s21  ;;  %s141_s2 = smul.f32 -5.684342e-14, %s105_s13 }
  0x44   :  { %s134_s17 = sadd.f32 %s133_s19, %s131_s24  ;;  %s139_s7 = smul.f32 %s138_s10, %s108_s6 }
  0x45   :  { %s142_s29 = smul.f32 %s141_s2, %s108_s6  ;;  %s126_s8 = sadd.f32 %s125_s23, %s90_s25 }
  0x46   :  { %s137_s3 = sadd.f32 %s136_s4, %s134_s17  ;;  %s234_s5 = smov [#allocation7]  }
  0x47   :  { %s318_s1 = sld [smem:[#allocation12_spill]] }
  0x48   :  { %s140_s26 = sadd.f32 %s139_s7, %s137_s3 }
  0x4a   :  { %s143_s16 = sadd.f32 %s142_s29, %s140_s26 }
  0x4c   :  { %s144_s27 = sadd.f32 %s143_s16, %s126_s8 }
  0x4d   :  { %s153_s9 = sshll.u32 %s318_s1, 4  ;;  %s154_s9 = int_to_ptr.hbm [resolvable:$true] %s153_s9 }
  0x4e   :  { %s145_s14 = smul.f32 0.00125, %s144_s27 }
  0x50   :  { %147 = sst [smem:[#allocation7]] %s145_s14 }
  0x51   :  { %156 = dma.smem_to_hbm %s234_s5, 16, %s154_s9, [#allocation3]  }
  0x52   :  { %230 = dma.done.wait [#allocation3], 16  }
  0x53   :  { %231 = vsyncadd [#allocation3], 4294967280 }
  0x54   :  { %161 = sfence }
  0x55   :  { %162 = vsyncpa [#allocation3], 1 }
  0x56   :  { %163 = vsyncpa [#allocation4], 1 }
  0x57   :  { %164 = vsyncpa [#allocation6], 1 }

</bundles_post_ra>
